<compile_context>
chip_gen: v6e
topology: v6e:2x2x1
jax: 0.10.0
libtpu: 0.0.40
codegen_flags: <defaults>
</compile_context>

<pallas_src>
import functools

import jax
import jax.numpy as jnp
from jax.experimental import pallas as pl
from jax.experimental.pallas import tpu as pltpu


def _round_up(x: int, m: int) -> int:
    return ((x + m - 1) // m) * m


def _mlp_kernel(x_ref, w1_ref, w2_ref, o_ref):
    # Layer 1 on the MXU, f32 accumulation: (TB, K) @ (K, H) -> (TB, H)
    h = jnp.dot(x_ref[...], w1_ref[...], preferred_element_type=jnp.float32)
    # ReLU in-register: VPU op, co-issues under the MXU work (free), no
    # materialization of the hidden activation to HBM.
    h = jnp.maximum(h, 0.0)
    # Layer 2 on the MXU, f32 accumulation: (TB, H) @ (H, N) -> (TB, N)
    out = jnp.dot(h.astype(w2_ref.dtype), w2_ref[...],
                  preferred_element_type=jnp.float32)
    o_ref[...] = out.astype(o_ref.dtype)


@functools.partial(jax.jit, static_argnames=("block_batch",))
def simple_nn_forward(x, w1, w2, *, block_batch=256):
    """Fused SimpleNN forward.

    Args:
      x:  (B, input_size)
      w1: (hidden, input_size)   -- torch nn.Linear weight layout (out, in)
      w2: (output_size, hidden)  -- torch nn.Linear weight layout (out, in)
    Returns:
      (B, output_size)
    """
    B, K = x.shape
    H, K2 = w1.shape
    N, H2 = w2.shape
    assert K == K2 and H == H2, "weight shapes inconsistent with x"

    # Pre-transpose once in the wrapper so the kernel does plain (M,K)x(K,N)
    # row-major dots (no transposes inside the kernel).
    w1_t = w1.T  # (K, H)
    w2_t = w2.T  # (H, N)

    # Pad to lane-dense, (8,128)-friendly shapes.  Zero padding is exact:
    # padded K columns contribute 0; padded hidden units are 0 -> relu(0)=0
    # and multiply zero rows of W2; padded output lanes are sliced off below.
    K_pad = _round_up(K, 128)
    H_pad = _round_up(H, 128)
    N_pad = _round_up(N, 128)
    TB = min(block_batch, _round_up(B, 8))   # batch tile (sublane multiple of 8)
    B_pad = _round_up(B, TB)

    x_p = jnp.pad(x, ((0, B_pad - B), (0, K_pad - K)))
    w1_p = jnp.pad(w1_t, ((0, K_pad - K), (0, H_pad - H)))
    w2_p = jnp.pad(w2_t, ((0, H_pad - H), (0, N_pad - N)))

    grid = (B_pad // TB,)

    out_p = pl.pallas_call(
        _mlp_kernel,
        out_shape=jax.ShapeDtypeStruct((B_pad, N_pad), x.dtype),
        grid_spec=pltpu.PrefetchScalarGridSpec(
            num_scalar_prefetch=0,
            grid=grid,
            in_specs=[
                # x: stream one batch tile per grid step.
                pl.BlockSpec((TB, K_pad), lambda i: (i, 0)),
                # W1^T: fully VMEM-resident (same block every step -> no re-DMA).
                pl.BlockSpec((K_pad, H_pad), lambda i: (0, 0)),
                # W2^T: fully VMEM-resident.
                pl.BlockSpec((H_pad, N_pad), lambda i: (0, 0)),
            ],
            out_specs=pl.BlockSpec((TB, N_pad), lambda i: (i, 0)),
        ),
        compiler_params=pltpu.CompilerParams(
            dimension_semantics=("parallel",),  # batch tiles are independent
        ),
    )(x_p, w1_p, w2_p)

    return out_p[:B, :N]


if __name__ == "__main__":
    key = jax.random.PRNGKey(0)
    k1, k2, k3 = jax.random.split(key, 3)

    # Small shapes consistent with the module: hidden is fixed at 10.
    batch, input_size, hidden, output_size = 8, 16, 10, 4

    x = jax.random.normal(k1, (batch, input_size), dtype=jnp.float32)
    # torch.nn.Linear weight layout: (out_features, in_features), bias=False.
    w1 = jax.random.normal(k2, (hidden, input_size), dtype=jnp.float32) * 0.1
    w2 = jax.random.normal(k3, (output_size, hidden), dtype=jnp.float32) * 0.1

    out = jax.block_until_ready(simple_nn_forward(x, w1, w2))

    # Pure-JAX reference of the PyTorch forward.
    ref = jnp.maximum(x @ w1.T, 0.0) @ w2.T
    assert out.shape == ref.shape, (out.shape, ref.shape)
    max_err = jnp.max(jnp.abs(out - ref))
    assert jnp.allclose(out, ref, atol=1e-3, rtol=1e-3), f"max err {max_err}"

    print("KERNEL_OK")
</pallas_src>

<mosaic_0001>
module attributes {stable_mosaic.version = 11 : i64} {
  func.func @_mlp_kernel(%arg0: i32, %arg1: memref<8x128xf32, #tpu.memory_space<vmem>>, %arg2: memref<128x128xf32, #tpu.memory_space<vmem>>, %arg3: memref<128x128xf32, #tpu.memory_space<vmem>>, %arg4: memref<8x128xf32, #tpu.memory_space<vmem>>) attributes {dimension_semantics = [#tpu.dimension_semantics<parallel>], iteration_bounds = array<i64: 1>, scalar_prefetch = 0 : i64, scratch_operands = 0 : i64, tpu.core_type = #tpu.core_type<tc>, window_params = [{transform_indices = @transform_0, window_bounds = array<i64: 8, 128>}, {pipeline_mode = #tpu.pipeline_mode<synchronous>, transform_indices = @transform_1, window_bounds = array<i64: 128, 128>}, {pipeline_mode = #tpu.pipeline_mode<synchronous>, transform_indices = @transform_2, window_bounds = array<i64: 128, 128>}, {transform_indices = @transform_3, window_bounds = array<i64: 8, 128>}]} {
    %c0 = arith.constant 0 : index
    %c0_0 = arith.constant 0 : index
    %0 = vector.load %arg1[%c0, %c0_0] : memref<8x128xf32, #tpu.memory_space<vmem>>, vector<8x128xf32>
    %c0_1 = arith.constant 0 : index
    %c0_2 = arith.constant 0 : index
    %1 = vector.load %arg2[%c0_1, %c0_2] : memref<128x128xf32, #tpu.memory_space<vmem>>, vector<128x128xf32>
    %cst = arith.constant dense<0.000000e+00> : vector<8x128xf32>
    %2 = tpu.matmul %0, %1, %cst {dimension_numbers = #tpu.dot_dimension_numbers<[1], [0], [0], [1], [0, 0, 1, 1], [], []>} : vector<8x128xf32>, vector<128x128xf32>, vector<8x128xf32> -> vector<8x128xf32>
    %cst_3 = arith.constant 0.000000e+00 : f32
    %3 = vector.broadcast %cst_3 : f32 to vector<8x128xf32>
    %4 = arith.maximumf %2, %3 : vector<8x128xf32>
    %c0_4 = arith.constant 0 : index
    %c0_5 = arith.constant 0 : index
    %5 = vector.load %arg3[%c0_4, %c0_5] : memref<128x128xf32, #tpu.memory_space<vmem>>, vector<128x128xf32>
    %cst_6 = arith.constant dense<0.000000e+00> : vector<8x128xf32>
    %6 = tpu.matmul %4, %5, %cst_6 {dimension_numbers = #tpu.dot_dimension_numbers<[1], [0], [0], [1], [0, 0, 1, 1], [], []>} : vector<8x128xf32>, vector<128x128xf32>, vector<8x128xf32> -> vector<8x128xf32>
    %c0_7 = arith.constant 0 : index
    %c0_8 = arith.constant 0 : index
    %7 = vector.load %arg4[%c0_7, %c0_8] : memref<8x128xf32, #tpu.memory_space<vmem>>, vector<8x128xf32>
    tpu.vector_store %arg4[%c0_7, %c0_8], %6 {strides = array<i32>} : memref<8x128xf32, #tpu.memory_space<vmem>>, vector<8x128xf32>,
    return
  }
  func.func @transform_0(%arg0: i32) -> (i32, i32) {
    %c0_i32 = arith.constant 0 : i32
    %c0_i32_0 = arith.constant 0 : i32
    return %arg0, %c0_i32 : i32, i32
  }
  func.func @transform_1(%arg0: i32) -> (i32, i32) {
    %c0_i32 = arith.constant 0 : i32
    %c0_i32_0 = arith.constant 0 : i32
    %c0_i32_1 = arith.constant 0 : i32
    return %c0_i32, %c0_i32_0 : i32, i32
  }
  func.func @transform_2(%arg0: i32) -> (i32, i32) {
    %c0_i32 = arith.constant 0 : i32
    %c0_i32_0 = arith.constant 0 : i32
    %c0_i32_1 = arith.constant 0 : i32
    return %c0_i32, %c0_i32_0 : i32, i32
  }
  func.func @transform_3(%arg0: i32) -> (i32, i32) {
    %c0_i32 = arith.constant 0 : i32
    %c0_i32_0 = arith.constant 0 : i32
    return %arg0, %c0_i32 : i32, i32
  }
}

</mosaic_0001>

<bundles_post_ra>
// kernel: simple_nn_forward.1
= control target key start
LH: loop header
LB: loop body
LE: loop exit
PB: predicated region body
PF: predicated region fallthrough
CT: control target
= control target key end

     0   :  { %v299_v0 = vmov 0.0   ;;  %vm300_vm0 = vmmov 0   ;;  %s457_s1 = inlined_call_operand.vmem [shape: f32[128,128], index: 1, kind: input, shape index: {}]   ;;  %s458_s2 = inlined_call_operand.vmem [shape: f32[128,128], index: 2, kind: input, shape index: {}]   ;;  %s459_s0 = inlined_call_operand.vmem [shape: f32[8,128], index: 0, kind: input, shape index: {}]   ;;  %s460_s3 = inlined_call_operand.vmem [shape: f32[8,128], index: 3, kind: output, shape index: {}]  }
   0x1   :  { %227 = vmatprep.subr.mxu0 %v299_v0  ;;  %v30_v1 = vld [vmem:[%s457_s1 + $0x78] sm:$0xff]  ;;  %v29_v2 = vld [vmem:[%s457_s1 + $0x70] sm:$0xff]  ;;  %259 = vmatprep.mubr.msk.f32.mxu0 %vm300_vm0, %v299_v0  ;;  %v28_v3 = vld [vmem:[%s457_s1 + $0x68] sm:$0xff] }
   0x2   :  { %228 = vmatpush3.msra.mxu0 %v30_v1  ;;  %262 = vmatprep.subr.mxu1 %v299_v0  ;;  %v27_v4 = vld [vmem:[%s457_s1 + $0x60] sm:$0xff]  ;;  %v117_v5 = vld [vmem:[%s458_s2 + $0x78] sm:$0xff]  ;;  %v116_v7 = vld [vmem:[%s458_s2 + $0x70] sm:$0xff] }
   0x3   :  { %229 = vmatprep.subr.mxu0 %v299_v0  ;;  %294 = vmatprep.mubr.msk.f32.mxu1 %vm300_vm0, %v299_v0  ;;  %v26_v6 = vld [vmem:[%s457_s1 + $0x58] sm:$0xff]  ;;  %v115_v8 = vld [vmem:[%s458_s2 + $0x68] sm:$0xff]  ;;  %v25_v9 = vld [vmem:[%s457_s1 + $0x50] sm:$0xff] }
   0x4   :  { %230 = vmatpush3.msra.mxu0 %v29_v2  ;;  %263 = vmatpush3.msra.mxu1 %v117_v5  ;;  %v114_v10 = vld [vmem:[%s458_s2 + $0x60] sm:$0xff]  ;;  %v24_v11 = vld [vmem:[%s457_s1 + $0x48] sm:$0xff]  ;;  %v113_v12 = vld [vmem:[%s458_s2 + $0x58] sm:$0xff] }
   0x5   :  { %231 = vmatprep.subr.mxu0 %v299_v0  ;;  %264 = vmatprep.subr.mxu1 %v299_v0  ;;  %v23_v13 = vld [vmem:[%s457_s1 + $0x40] sm:$0xff]  ;;  %v112_v14 = vld [vmem:[%s458_s2 + $0x50] sm:$0xff]  ;;  %v22_v15 = vld [vmem:[%s457_s1 + $0x38] sm:$0xff] }
   0x6   :  { %232 = vmatpush3.msra.mxu0 %v28_v3  ;;  %265 = vmatpush3.msra.mxu1 %v116_v7  ;;  %v111_v16 = vld [vmem:[%s458_s2 + $0x48] sm:$0xff]  ;;  %v21_v17 = vld [vmem:[%s457_s1 + $0x30] sm:$0xff]  ;;  %v110_v18 = vld [vmem:[%s458_s2 + $0x40] sm:$0xff] }
   0x7   :  { %233 = vmatprep.subr.mxu0 %v299_v0  ;;  %266 = vmatprep.subr.mxu1 %v299_v0  ;;  %v20_v19 = vld [vmem:[%s457_s1 + $0x28] sm:$0xff]  ;;  %v109_v20 = vld [vmem:[%s458_s2 + $0x38] sm:$0xff]  ;;  %v19_v21 = vld [vmem:[%s457_s1 + $0x20] sm:$0xff] }
   0x8   :  { %234 = vmatpush3.msra.mxu0 %v27_v4  ;;  %267 = vmatpush3.msra.mxu1 %v115_v8  ;;  %v108_v22 = vld [vmem:[%s458_s2 + $0x30] sm:$0xff]  ;;  %v18_v23 = vld [vmem:[%s457_s1 + $0x18] sm:$0xff]  ;;  %v107_v24 = vld [vmem:[%s458_s2 + $0x28] sm:$0xff] }
   0x9   :  { %235 = vmatprep.subr.mxu0 %v299_v0  ;;  %268 = vmatprep.subr.mxu1 %v299_v0  ;;  %v17_v25 = vld [vmem:[%s457_s1 + $0x10] sm:$0xff]  ;;  %v106_v26 = vld [vmem:[%s458_s2 + $0x20] sm:$0xff]  ;;  %v16_v27 = vld [vmem:[%s457_s1 + $0x8] sm:$0xff] }
   0xa   :  { %236 = vmatpush3.msra.mxu0 %v26_v6  ;;  %269 = vmatpush3.msra.mxu1 %v114_v10  ;;  %v105_v28 = vld [vmem:[%s458_s2 + $0x18] sm:$0xff]  ;;  %v15_v29 = vld [vmem:[%s457_s1] sm:$0xff]  ;;  %v104_v31 = vld [vmem:[%s458_s2 + $0x10] sm:$0xff] }
   0xb   :  { %237 = vmatprep.subr.mxu0 %v299_v0  ;;  %270 = vmatprep.subr.mxu1 %v299_v0  ;;  %v14_v30 = vld [vmem:[%s459_s0] sm:$0xff]  ;;  %v103_v32 = vld [vmem:[%s458_s2 + $0x8] sm:$0xff] }
   0xc   :  { %238 = vmatpush3.msra.mxu0 %v25_v9  ;;  %271 = vmatpush3.msra.mxu1 %v113_v12  ;;  %v102_v33 = vld [vmem:[%s458_s2] sm:$0xff] }
   0xd   :  { %239 = vmatprep.subr.mxu0 %v299_v0  ;;  %272 = vmatprep.subr.mxu1 %v299_v0 }
   0xe   :  { %240 = vmatpush3.msra.mxu0 %v24_v11  ;;  %273 = vmatpush3.msra.mxu1 %v112_v14 }
   0xf   :  { %241 = vmatprep.subr.mxu0 %v299_v0  ;;  %274 = vmatprep.subr.mxu1 %v299_v0 }
  0x10   :  { %242 = vmatpush3.msra.mxu0 %v23_v13  ;;  %275 = vmatpush3.msra.mxu1 %v111_v16 }
  0x11   :  { %243 = vmatprep.subr.mxu0 %v299_v0  ;;  %276 = vmatprep.subr.mxu1 %v299_v0 }
  0x12   :  { %244 = vmatpush3.msra.mxu0 %v22_v15  ;;  %277 = vmatpush3.msra.mxu1 %v110_v18 }
  0x13   :  { %245 = vmatprep.subr.mxu0 %v299_v0  ;;  %278 = vmatprep.subr.mxu1 %v299_v0 }
  0x14   :  { %246 = vmatpush3.msra.mxu0 %v21_v17  ;;  %279 = vmatpush3.msra.mxu1 %v109_v20 }
  0x15   :  { %247 = vmatprep.subr.mxu0 %v299_v0  ;;  %280 = vmatprep.subr.mxu1 %v299_v0 }
  0x16   :  { %248 = vmatpush3.msra.mxu0 %v20_v19  ;;  %281 = vmatpush3.msra.mxu1 %v108_v22 }
  0x17   :  { %249 = vmatprep.subr.mxu0 %v299_v0  ;;  %282 = vmatprep.subr.mxu1 %v299_v0 }
  0x18   :  { %250 = vmatpush3.msra.mxu0 %v19_v21  ;;  %283 = vmatpush3.msra.mxu1 %v107_v24 }
  0x19   :  { %251 = vmatprep.subr.mxu0 %v299_v0  ;;  %284 = vmatprep.subr.mxu1 %v299_v0 }
  0x1a   :  { %252 = vmatpush3.msra.mxu0 %v18_v23  ;;  %285 = vmatpush3.msra.mxu1 %v106_v26 }
  0x1b   :  { %253 = vmatprep.subr.mxu0 %v299_v0  ;;  %286 = vmatprep.subr.mxu1 %v299_v0 }
  0x1c   :  { %254 = vmatpush3.msra.mxu0 %v17_v25  ;;  %287 = vmatpush3.msra.mxu1 %v105_v28 }
  0x1d   :  { %255 = vmatprep.subr.mxu0 %v299_v0  ;;  %288 = vmatprep.subr.mxu1 %v299_v0 }
  0x1e   :  { %256 = vmatpush3.msra.mxu0 %v16_v27  ;;  %289 = vmatpush3.msra.mxu1 %v104_v31 }
  0x1f   :  { %257 = vmatprep.subr.mxu0 %v299_v0  ;;  %290 = vmatprep.subr.mxu1 %v299_v0 }
  0x20   :  { %258 = vmatpush3.msra.mxu0 %v15_v29  ;;  %291 = vmatpush3.msra.mxu1 %v103_v32 }
  0x21   :  { %260 = vmatmul.mubr.f32.vlgmr.msra.gmra.mxu0 %v14_v30  ;;  %292 = vmatprep.subr.mxu1 %v299_v0 }
  0x22   :  { %293 = vmatpush3.msra.mxu1 %v102_v33 }
  0xe1   :  { %v97_v34 = vpop.f32.mrf.mxu0 }
  0xe2   :  { %v101_v35 = vmax.f32 %v97_v34, 0.0 }
  0xe3   :  { %v261_v36 = vpop.f32.mrf.mxu0 }
  0xe4   :  { %295 = vmatmul.mubr.f32.vlgmr.msra.gmra.mxu1 %v101_v35 }
 0x1a4   :  { %v184_v37 = vpop.f32.mrf.mxu1 }
 0x1a5   :  { %188 = vst [vmem:[%s460_s3] sm:$0xff] %v184_v37 }
 0x1a6   :  { %v296_v38 = vpop.f32.mrf.mxu1 }

</bundles_post_ra>
